<compile_context>
chip_gen: v7x
topology: tpu7x:2x2x1
jax: 0.10.0
libtpu: 0.0.40
codegen_flags: <defaults>
</compile_context>

<pallas_src>
import math
import jax
import jax.numpy as jnp
from jax.experimental import pallas as pl
from jax.experimental.pallas import tpu as pltpu


def _round_up(x, m):
    return ((x + m - 1) // m) * m


# ---------------------------------- kernels ----------------------------------

def _noisy_train_kernel(x_ref, xs_ref, wmu_ref, wsig_ref, eout_ref, beff_ref,
                        o_ref, accmu_ref, accsig_ref):
    """y = x@Wmu + ((x*e_in)@Wsig) * e_out + b_eff  (factorized noise, rank-1).

    No weight-sized epsilon is ever materialized and no per-tile VPU weight
    combine is done: both matmuls go straight to the MXU in bf16, the e_out
    scale and bias are applied once on the f32 accumulators at finalize."""
    k = pl.program_id(2)

    @pl.when(k == 0)
    def _():
        accmu_ref[...] = jnp.zeros_like(accmu_ref)
        accsig_ref[...] = jnp.zeros_like(accsig_ref)

    accmu_ref[...] += jnp.dot(x_ref[...], wmu_ref[...],
                              preferred_element_type=jnp.float32)
    accsig_ref[...] += jnp.dot(xs_ref[...], wsig_ref[...],
                               preferred_element_type=jnp.float32)

    @pl.when(k == pl.num_programs(2) - 1)
    def _():
        y = accmu_ref[...] + accsig_ref[...] * eout_ref[...] + beff_ref[...]
        o_ref[...] = y.astype(o_ref.dtype)


def _eval_kernel(x_ref, wmu_ref, bmu_ref, o_ref, acc_ref):
    """y = x @ Wmu + bias_mu (module.eval() path -- no sigma/epsilon traffic)."""
    k = pl.program_id(2)

    @pl.when(k == 0)
    def _():
        acc_ref[...] = jnp.zeros_like(acc_ref)

    acc_ref[...] += jnp.dot(x_ref[...], wmu_ref[...],
                            preferred_element_type=jnp.float32)

    @pl.when(k == pl.num_programs(2) - 1)
    def _():
        o_ref[...] = (acc_ref[...] + bmu_ref[...]).astype(o_ref.dtype)


# ------------------------------ one-time prepare ------------------------------

def _weight_tiles(in_f, out_f):
    # Lane-dense tiles, grown per perf review (bigger tiles amortize the
    # ~0.35 us per-grid-step overhead and give the MXU longer K runs) but
    # capped so bf16 double-buffered streams stay a few MiB (v7x: 64 MiB VMEM).
    tn = min(_round_up(out_f, 128), 512)
    tk = min(_round_up(in_f, 128), 1024)
    return tn, tk


def noisy_linear_prepare(weight_mu, weight_sigma, bias_mu, bias_sigma,
                         *, stream_dtype=jnp.bfloat16):
    """One-time layout plumbing (call at parameter init, NOT per forward):
    transpose weights to [in, out], zero-pad to tile multiples, cast the
    MXU-streamed weights to bf16. Biases stay f32 (combined in-kernel epilogue
    / wrapper in f32)."""
    out_f, in_f = weight_mu.shape
    tn, tk = _weight_tiles(in_f, out_f)
    in_p, out_p = _round_up(in_f, tk), _round_up(out_f, tn)
    f32 = jnp.float32

    wmu_t = (jnp.zeros((in_p, out_p), f32)
             .at[:in_f, :out_f].set(weight_mu.astype(f32).T)
             .astype(stream_dtype))
    wsig_t = (jnp.zeros((in_p, out_p), f32)
              .at[:in_f, :out_f].set(weight_sigma.astype(f32).T)
              .astype(stream_dtype))
    bmu_p = jnp.zeros((1, out_p), f32).at[0, :out_f].set(bias_mu.astype(f32))
    bsig_p = jnp.zeros((1, out_p), f32).at[0, :out_f].set(bias_sigma.astype(f32))

    return dict(wmu_t=wmu_t, wsig_t=wsig_t, bmu_p=bmu_p, bsig_p=bsig_p,
                in_f=in_f, out_f=out_f, in_p=in_p, out_p=out_p,
                tn=tn, tk=tk, stream_dtype=stream_dtype)


# --------------------------------- forward -----------------------------------

def noisy_linear_apply(prep, x, eps_in=None, eps_out=None, bias_epsilon=None,
                       *, training=True, tm=None,
                       vmem_limit_bytes=48 * 1024 * 1024):
    """Pallas-backed NoisyLinear forward using prepared (padded/bf16) weights.

    x:        [B, in_features] float32
    eps_in:   [in_features]   factorized noise (weight_epsilon = eps_out ⊗ eps_in)
    eps_out:  [out_features]
    returns:  [B, out_features] float32
    """
    B, in_f = x.shape
    assert in_f == prep["in_f"]
    out_f, in_p, out_p = prep["out_f"], prep["in_p"], prep["out_p"]
    tn, tk = prep["tn"], prep["tk"]
    sdt = prep["stream_dtype"]
    f32 = jnp.float32

    if tm is None:
        tm = min(_round_up(B, 8), 256)
    B_p = _round_up(B, tm)

    # v7x has 2 TensorCores sharding the "parallel" grid axes: make sure the
    # parallel part of the grid has >= 2 tiles when the problem allows it.
    if (B_p // tm) * (out_p // tn) < 2:
        if tm >= 16 and tm % 16 == 0:
            tm //= 2
        elif (out_p // 2) >= 128 and (out_p // 2) % 128 == 0:
            tn = out_p // 2

    grid = (B_p // tm, out_p // tn, in_p // tk)

    # Per-call activation padding (tiny: [B, in]); combines stay in f32.
    xp = jnp.zeros((B_p, in_p), f32).at[:B, :in_f].set(x.astype(f32))

    x_spec = pl.BlockSpec((tm, tk), lambda i, j, k: (i, k))
    # NOTE: if profiling shows exposed weight DMA at large tiles, add
    # pipeline_mode=pl.Buffered(3) to w_spec (costs one extra weight tile).
    w_spec = pl.BlockSpec((tk, tn), lambda i, j, k: (k, j))
    row_spec = pl.BlockSpec((1, tn), lambda i, j, k: (0, j))
    o_spec = pl.BlockSpec((tm, tn), lambda i, j, k: (i, j))

    out_shape = jax.ShapeDtypeStruct((B_p, out_p), jnp.float32)
    compiler_params = pltpu.CompilerParams(
        dimension_semantics=("parallel", "parallel", "arbitrary"),
        vmem_limit_bytes=vmem_limit_bytes)

    if training:
        if bias_epsilon is None:
            bias_epsilon = eps_out
        # Tiny per-call vectors: padded e_out row + effective bias row.
        eout_p = jnp.zeros((1, out_p), f32).at[0, :out_f].set(eps_out.astype(f32))
        beps_p = jnp.zeros((1, out_p), f32).at[0, :out_f].set(
            bias_epsilon.astype(f32))
        beff_p = prep["bmu_p"] + prep["bsig_p"] * beps_p
        # Rank-1 trick: scale x rows by eps_in (f32), cast only MXU operands.
        ein_p = jnp.zeros((in_p,), f32).at[:in_f].set(eps_in.astype(f32))
        xs = xp * ein_p[None, :]

        y_p = pl.pallas_call(
            _noisy_train_kernel,
            out_shape=out_shape,
            grid_spec=pltpu.PrefetchScalarGridSpec(
                num_scalar_prefetch=0,
                grid=grid,
                in_specs=[x_spec, x_spec, w_spec, w_spec, row_spec, row_spec],
                out_specs=o_spec,
                scratch_shapes=[pltpu.VMEM((tm, tn), jnp.float32),
                                pltpu.VMEM((tm, tn), jnp.float32)]),
            compiler_params=compiler_params,
        )(xp.astype(sdt), xs.astype(sdt), prep["wmu_t"], prep["wsig_t"],
          eout_p, beff_p)
    else:
        y_p = pl.pallas_call(
            _eval_kernel,
            out_shape=out_shape,
            grid_spec=pltpu.PrefetchScalarGridSpec(
                num_scalar_prefetch=0,
                grid=grid,
                in_specs=[x_spec, w_spec, row_spec],
                out_specs=o_spec,
                scratch_shapes=[pltpu.VMEM((tm, tn), jnp.float32)]),
            compiler_params=compiler_params,
        )(xp.astype(sdt), prep["wmu_t"], prep["bmu_p"])

    return y_p[:B, :out_f]


# ---------------- deterministic parameter / noise construction ----------------

def _scale_noise(key, size):
    # matches NoisyLinear._scale_noise: sign(x) * sqrt(|x|), x ~ N(0,1)
    x = jax.random.normal(key, (size,), dtype=jnp.float32)
    return jnp.sign(x) * jnp.sqrt(jnp.abs(x))


def make_noisy_linear_params(key, in_features, out_features, std_init=0.5):
    k_wmu, k_bmu, k_ein, k_eout = jax.random.split(key, 4)
    mu_range = 1.0 / math.sqrt(in_features)

    weight_mu = jax.random.uniform(
        k_wmu, (out_features, in_features), jnp.float32, -mu_range, mu_range)
    weight_sigma = jnp.full((out_features, in_features),
                            std_init / math.sqrt(in_features), jnp.float32)
    bias_mu = jax.random.uniform(
        k_bmu, (out_features,), jnp.float32, -mu_range, mu_range)
    bias_sigma = jnp.full((out_features,),
                          std_init / math.sqrt(out_features), jnp.float32)

    # Factorized noise: weight_epsilon = outer(eps_out, eps_in) is never
    # materialized; the kernel uses the rank-1 identity instead.
    eps_in = _scale_noise(k_ein, in_features)      # [in]
    eps_out = _scale_noise(k_eout, out_features)   # [out]
    bias_epsilon = eps_out                         # as in the module buffer

    return dict(weight_mu=weight_mu, weight_sigma=weight_sigma,
                eps_in=eps_in, eps_out=eps_out,
                bias_mu=bias_mu, bias_sigma=bias_sigma,
                bias_epsilon=bias_epsilon)


if __name__ == "__main__":
    key = jax.random.PRNGKey(0)
    k_params, k_x = jax.random.split(key)

    B, in_features, out_features = 8, 32, 64
    params = make_noisy_linear_params(k_params, in_features, out_features)
    x = jax.random.normal(k_x, (B, in_features), dtype=jnp.float32)

    # One-time weight layout/pad/bf16-cast (persisted across forwards).
    prep = noisy_linear_prepare(params["weight_mu"], params["weight_sigma"],
                                params["bias_mu"], params["bias_sigma"])

    # Training-mode forward (noisy weights), as in the default module state.
    y = noisy_linear_apply(prep, x, params["eps_in"], params["eps_out"],
                           params["bias_epsilon"], training=True)
    jax.block_until_ready(y)

    # Pure-JAX f32 reference (reconstruct the full epsilon buffer).
    weight_epsilon = jnp.outer(params["eps_out"], params["eps_in"])
    w_eff = params["weight_mu"] + params["weight_sigma"] * weight_epsilon
    b_eff = params["bias_mu"] + params["bias_sigma"] * params["bias_epsilon"]
    y_ref = x @ w_eff.T + b_eff
    assert y.shape == y_ref.shape
    # bf16-streamed MXU operands with f32 accumulation -> relaxed tolerance.
    assert jnp.allclose(y, y_ref, atol=5e-2, rtol=2e-2), "train-mode mismatch"

    # Eval-mode forward (mu only) uses the pruned-input kernel.
    y_eval = noisy_linear_apply(prep, x, training=False)
    jax.block_until_ready(y_eval)
    y_eval_ref = x @ params["weight_mu"].T + params["bias_mu"]
    assert jnp.allclose(y_eval, y_eval_ref, atol=5e-2, rtol=2e-2), "eval mismatch"

    print("KERNEL_OK")
</pallas_src>

<mosaic_0001>
module attributes {stable_mosaic.version = 11 : i64} {
  func.func @_noisy_train_kernel(%arg0: i32, %arg1: i32, %arg2: i32, %arg3: memref<8x128xbf16, #tpu.memory_space<vmem>>, %arg4: memref<8x128xbf16, #tpu.memory_space<vmem>>, %arg5: memref<128x128xbf16, #tpu.memory_space<vmem>>, %arg6: memref<128x128xbf16, #tpu.memory_space<vmem>>, %arg7: memref<1x128xf32, #tpu.memory_space<vmem>>, %arg8: memref<1x128xf32, #tpu.memory_space<vmem>>, %arg9: memref<8x128xf32, #tpu.memory_space<vmem>>, %arg10: memref<8x128xf32, #tpu.memory_space<vmem>>, %arg11: memref<8x128xf32, #tpu.memory_space<vmem>>) attributes {dimension_semantics = [#tpu.dimension_semantics<parallel>, #tpu.dimension_semantics<parallel>, #tpu.dimension_semantics<arbitrary>], iteration_bounds = array<i64: 1, 1, 1>, scalar_prefetch = 0 : i64, scratch_operands = 2 : i64, tpu.core_type = #tpu.core_type<tc>, window_params = [{transform_indices = @transform_0, window_bounds = array<i64: 8, 128>}, {transform_indices = @transform_1, window_bounds = array<i64: 8, 128>}, {transform_indices = @transform_2, window_bounds = array<i64: 128, 128>}, {transform_indices = @transform_3, window_bounds = array<i64: 128, 128>}, {transform_indices = @transform_4, window_bounds = array<i64: 1, 128>}, {transform_indices = @transform_5, window_bounds = array<i64: 1, 128>}, {transform_indices = @transform_6, window_bounds = array<i64: 8, 128>}]} {
    %c0_i32 = arith.constant 0 : i32
    %0 = arith.cmpi eq, %arg2, %c0_i32 : i32
    %1 = arith.extui %0 : i1 to i32
    %c0_i32_0 = arith.constant 0 : i32
    %2 = arith.cmpi ne, %1, %c0_i32_0 : i32
    scf.if %2 {
      %cst_19 = arith.constant 0.000000e+00 : f32
      %18 = vector.broadcast %cst_19 : f32 to vector<8x128xf32>
      %c0_20 = arith.constant 0 : index
      %c0_21 = arith.constant 0 : index
      %19 = vector.load %arg10[%c0_20, %c0_21] : memref<8x128xf32, #tpu.memory_space<vmem>>, vector<8x128xf32>
      tpu.vector_store %arg10[%c0_20, %c0_21], %18 {strides = array<i32>} : memref<8x128xf32, #tpu.memory_space<vmem>>, vector<8x128xf32>,
      %cst_22 = arith.constant 0.000000e+00 : f32
      %20 = vector.broadcast %cst_22 : f32 to vector<8x128xf32>
      %c0_23 = arith.constant 0 : index
      %c0_24 = arith.constant 0 : index
      %21 = vector.load %arg11[%c0_23, %c0_24] : memref<8x128xf32, #tpu.memory_space<vmem>>, vector<8x128xf32>
      tpu.vector_store %arg11[%c0_23, %c0_24], %20 {strides = array<i32>} : memref<8x128xf32, #tpu.memory_space<vmem>>, vector<8x128xf32>,
    } else {
    }
    %c0 = arith.constant 0 : index
    %c0_1 = arith.constant 0 : index
    %3 = vector.load %arg10[%c0, %c0_1] : memref<8x128xf32, #tpu.memory_space<vmem>>, vector<8x128xf32>
    %c0_2 = arith.constant 0 : index
    %c0_3 = arith.constant 0 : index
    %4 = vector.load %arg3[%c0_2, %c0_3] : memref<8x128xbf16, #tpu.memory_space<vmem>>, vector<8x128xbf16>
    %c0_4 = arith.constant 0 : index
    %c0_5 = arith.constant 0 : index
    %5 = vector.load %arg5[%c0_4, %c0_5] : memref<128x128xbf16, #tpu.memory_space<vmem>>, vector<128x128xbf16>
    %cst = arith.constant dense<0.000000e+00> : vector<8x128xf32>
    %6 = tpu.matmul %4, %5, %cst {dimension_numbers = #tpu.dot_dimension_numbers<[1], [0], [0], [1], [0, 0, 1, 1], [], []>} : vector<8x128xbf16>, vector<128x128xbf16>, vector<8x128xf32> -> vector<8x128xf32>
    %7 = arith.addf %3, %6 : vector<8x128xf32>
    %c0_6 = arith.constant 0 : index
    %c0_7 = arith.constant 0 : index
    %8 = vector.load %arg10[%c0_6, %c0_7] : memref<8x128xf32, #tpu.memory_space<vmem>>, vector<8x128xf32>
    tpu.vector_store %arg10[%c0_6, %c0_7], %7 {strides = array<i32>} : memref<8x128xf32, #tpu.memory_space<vmem>>, vector<8x128xf32>,
    %c0_8 = arith.constant 0 : index
    %c0_9 = arith.constant 0 : index
    %9 = vector.load %arg11[%c0_8, %c0_9] : memref<8x128xf32, #tpu.memory_space<vmem>>, vector<8x128xf32>
    %c0_10 = arith.constant 0 : index
    %c0_11 = arith.constant 0 : index
    %10 = vector.load %arg4[%c0_10, %c0_11] : memref<8x128xbf16, #tpu.memory_space<vmem>>, vector<8x128xbf16>
    %c0_12 = arith.constant 0 : index
    %c0_13 = arith.constant 0 : index
    %11 = vector.load %arg6[%c0_12, %c0_13] : memref<128x128xbf16, #tpu.memory_space<vmem>>, vector<128x128xbf16>
    %cst_14 = arith.constant dense<0.000000e+00> : vector<8x128xf32>
    %12 = tpu.matmul %10, %11, %cst_14 {dimension_numbers = #tpu.dot_dimension_numbers<[1], [0], [0], [1], [0, 0, 1, 1], [], []>} : vector<8x128xbf16>, vector<128x128xbf16>, vector<8x128xf32> -> vector<8x128xf32>
    %13 = arith.addf %9, %12 : vector<8x128xf32>
    %c0_15 = arith.constant 0 : index
    %c0_16 = arith.constant 0 : index
    %14 = vector.load %arg11[%c0_15, %c0_16] : memref<8x128xf32, #tpu.memory_space<vmem>>, vector<8x128xf32>
    tpu.vector_store %arg11[%c0_15, %c0_16], %13 {strides = array<i32>} : memref<8x128xf32, #tpu.memory_space<vmem>>, vector<8x128xf32>,
    %c0_i32_17 = arith.constant 0 : i32
    %15 = arith.cmpi eq, %arg2, %c0_i32_17 : i32
    %16 = arith.extui %15 : i1 to i32
    %c0_i32_18 = arith.constant 0 : i32
    %17 = arith.cmpi ne, %16, %c0_i32_18 : i32
    scf.if %17 {
      %c0_19 = arith.constant 0 : index
      %c0_20 = arith.constant 0 : index
      %18 = vector.load %arg10[%c0_19, %c0_20] : memref<8x128xf32, #tpu.memory_space<vmem>>, vector<8x128xf32>
      %c0_21 = arith.constant 0 : index
      %c0_22 = arith.constant 0 : index
      %19 = vector.load %arg11[%c0_21, %c0_22] : memref<8x128xf32, #tpu.memory_space<vmem>>, vector<8x128xf32>
      %c0_23 = arith.constant 0 : index
      %c0_24 = arith.constant 0 : index
      %20 = vector.load %arg7[%c0_23, %c0_24] : memref<1x128xf32, #tpu.memory_space<vmem>>, vector<1x128xf32>
      %21 = vector.broadcast %20 : vector<1x128xf32> to vector<8x128xf32>
      %22 = arith.mulf %19, %21 : vector<8x128xf32>
      %23 = arith.addf %18, %22 : vector<8x128xf32>
      %c0_25 = arith.constant 0 : index
      %c0_26 = arith.constant 0 : index
      %24 = vector.load %arg8[%c0_25, %c0_26] : memref<1x128xf32, #tpu.memory_space<vmem>>, vector<1x128xf32>
      %25 = vector.broadcast %24 : vector<1x128xf32> to vector<8x128xf32>
      %26 = arith.addf %23, %25 : vector<8x128xf32>
      %c0_27 = arith.constant 0 : index
      %c0_28 = arith.constant 0 : index
      %27 = vector.load %arg9[%c0_27, %c0_28] : memref<8x128xf32, #tpu.memory_space<vmem>>, vector<8x128xf32>
      tpu.vector_store %arg9[%c0_27, %c0_28], %26 {strides = array<i32>} : memref<8x128xf32, #tpu.memory_space<vmem>>, vector<8x128xf32>,
    } else {
    }
    return
  }
  func.func @transform_0(%arg0: i32, %arg1: i32, %arg2: i32) -> (i32, i32) {
    %c0_i32 = arith.constant 0 : i32
    return %arg0, %arg2 : i32, i32
  }
  func.func @transform_1(%arg0: i32, %arg1: i32, %arg2: i32) -> (i32, i32) {
    %c0_i32 = arith.constant 0 : i32
    return %arg0, %arg2 : i32, i32
  }
  func.func @transform_2(%arg0: i32, %arg1: i32, %arg2: i32) -> (i32, i32) {
    %c0_i32 = arith.constant 0 : i32
    return %arg2, %arg1 : i32, i32
  }
  func.func @transform_3(%arg0: i32, %arg1: i32, %arg2: i32) -> (i32, i32) {
    %c0_i32 = arith.constant 0 : i32
    return %arg2, %arg1 : i32, i32
  }
  func.func @transform_4(%arg0: i32, %arg1: i32, %arg2: i32) -> (i32, i32) {
    %c0_i32 = arith.constant 0 : i32
    %c0_i32_0 = arith.constant 0 : i32
    return %c0_i32, %arg1 : i32, i32
  }
  func.func @transform_5(%arg0: i32, %arg1: i32, %arg2: i32) -> (i32, i32) {
    %c0_i32 = arith.constant 0 : i32
    %c0_i32_0 = arith.constant 0 : i32
    return %c0_i32, %arg1 : i32, i32
  }
  func.func @transform_6(%arg0: i32, %arg1: i32, %arg2: i32) -> (i32, i32) {
    %c0_i32 = arith.constant 0 : i32
    return %arg0, %arg1 : i32, i32
  }
}

</mosaic_0001>

<bundles_post_ra>
// kernel: tpu_custom_call.1
= control target key start
LH: loop header
LB: loop body
LE: loop exit
PB: predicated region body
PF: predicated region fallthrough
CT: control target
= control target key end

     0   :  { %11 = vsyncpa [#allocation5], 0  ;;  %s667_s0 = inlined_call_operand.hbm [shape: bf16[8,128], index: 0, kind: input, shape index: {}]   ;;  %s668_s1 = inlined_call_operand.hbm [shape: bf16[8,128], index: 1, kind: input, shape index: {}]   ;;  %s669_s2 = inlined_call_operand.hbm [shape: bf16[128,128], index: 2, kind: input, shape index: {}]   ;;  %s670_s3 = inlined_call_operand.hbm [shape: bf16[128,128], index: 3, kind: input, shape index: {}]   ;;  %s671_s4 = inlined_call_operand.vmem [shape: f32[1,128], index: 4, kind: input, shape index: {}]   ;;  %s672_s5 = inlined_call_operand.vmem [shape: f32[1,128], index: 5, kind: input, shape index: {}]   ;;  %s673_s6 = inlined_call_operand.hbm [shape: f32[8,128], index: 6, kind: output, shape index: {}]  }
   0x1   :  { %12 = vsyncpa [#allocation8], 0 }
   0x2   :  { %13 = vsyncpa [#allocation11], 0 }
   0x3   :  { %14 = vsyncpa [#allocation6], 0  ;;  %s557_s21 = smov [#allocation7]   ;;  %s558_s23 = smov [#allocation4]  }
   0x4   :  { %s31_s22 = sshll.u32 %s557_s21, 4  ;;  %s21_s24 = sshll.u32 %s558_s23, 4  ;;  %s32_s22 = int_to_ptr.vmem [resolvable:$true] %s31_s22  ;;  %s22_s24 = int_to_ptr.vmem [resolvable:$true] %s21_s24 }
   0x5   :  { %s439_s27 = scalar_lea.hbm %s668_s1, 64 }
   0x6   :  { %p440_p0 = scmp.ne.s32.totalorder %s668_s1, %s439_s27  ;;  %p443_p1 = scmp.lt.u32.totalorder %s439_s27, %s668_s1 }
   0x8   :  { %p445_p2 = pnand %p443_p1, %p440_p0 }
   0xa   :  { %448 = shalt.err (!%p445_p2)
}
   0xb   :  { %s449_s8 = scalar_lea.vmem %s32_s22, 64  ;;  %p454_p4 = scmp.lt.s32.totalorder %s32_s22, %s32_s22 }
   0xc   :  { %p450_p3 = scmp.ne.s32.totalorder %s32_s22, %s449_s8  ;;  %p455_p5 = scmp.lt.s32.totalorder %s449_s8, %s449_s8 }
   0xe   :  { %p456_p6 = por %p455_p5, %p454_p4 }
  0x10   :  { %p457_p7 = pnand %p456_p6, %p450_p3 }
  0x12   :  { %460 = shalt.err (!%p457_p7)
}
  0x13   :  { %34 = dma.hbm_to_vmem [thread:$0]  %s668_s1, 64, %s32_s22, [#allocation8]  }
  0x14   :  { %s461_s13 = scalar_lea.hbm %s667_s0, 64 }
  0x15   :  { %p462_p8 = scmp.ne.s32.totalorder %s667_s0, %s461_s13  ;;  %p465_p9 = scmp.lt.u32.totalorder %s461_s13, %s667_s0 }
  0x17   :  { %p467_p10 = pnand %p465_p9, %p462_p8 }
  0x19   :  { %470 = shalt.err (!%p467_p10)
}
  0x1a   :  { %s471_s18 = scalar_lea.vmem %s22_s24, 64  ;;  %p476_p12 = scmp.lt.s32.totalorder %s22_s24, %s22_s24 }
  0x1b   :  { %p472_p11 = scmp.ne.s32.totalorder %s22_s24, %s471_s18  ;;  %p477_p13 = scmp.lt.s32.totalorder %s471_s18, %s471_s18 }
  0x1d   :  { %p478_p0 = por %p477_p13, %p476_p12 }
  0x1f   :  { %p479_p1 = pnand %p478_p0, %p472_p11 }
  0x21   :  { %482 = shalt.err (!%p479_p1)
}
  0x22   :  { %24 = dma.hbm_to_vmem [thread:$0]  %s667_s0, 64, %s22_s24, [#allocation5]  }
  0x23   :  { %s559_s20 = smov [#allocation9]   ;;  %s483_s25 = scalar_lea.hbm %s669_s2, 1024 }
  0x24   :  { %s40_s21 = sshll.u32 %s559_s20, 4  ;;  %p484_p2 = scmp.ne.s32.totalorder %s669_s2, %s483_s25  ;;  %s41_s21 = int_to_ptr.vmem [resolvable:$true] %s40_s21 }
  0x25   :  { %p487_p3 = scmp.lt.u32.totalorder %s483_s25, %s669_s2 }
  0x27   :  { %p489_p4 = pnand %p487_p3, %p484_p2 }
  0x29   :  { %492 = shalt.err (!%p489_p4)
}
  0x2a   :  { %s493_s30 = scalar_lea.vmem %s41_s21, 1024  ;;  %p498_p6 = scmp.lt.s32.totalorder %s41_s21, %s41_s21 }
  0x2b   :  { %p494_p5 = scmp.ne.s32.totalorder %s41_s21, %s493_s30  ;;  %p499_p7 = scmp.lt.s32.totalorder %s493_s30, %s493_s30 }
  0x2d   :  { %p500_p8 = por %p499_p7, %p498_p6 }
  0x2f   :  { %p501_p9 = pnand %p500_p8, %p494_p5 }
  0x31   :  { %504 = shalt.err (!%p501_p9)
}
  0x32   :  { %s560_s0 = smov 64   ;;  %s561_s24 = smov 4  }
  0x33   :  { %46 = dma.hbm_to_vmem [thread:$0]  %s669_s2, 1024, %s41_s21, [#allocation8], %s560_s0, %s560_s0, %s561_s24  }
  0x34   :  { %s562_s9 = smov [#allocation10]   ;;  %s505_s13 = scalar_lea.hbm %s670_s3, 1024 }
  0x35   :  { %s52_s10 = sshll.u32 %s562_s9, 4  ;;  %p506_p10 = scmp.ne.s32.totalorder %s670_s3, %s505_s13  ;;  %s53_s10 = int_to_ptr.vmem [resolvable:$true] %s52_s10 }
  0x36   :  { %p509_p11 = scmp.lt.u32.totalorder %s505_s13, %s670_s3 }
  0x38   :  { %p511_p12 = pnand %p509_p11, %p506_p10 }
  0x3a   :  { %514 = shalt.err (!%p511_p12)
}
  0x3b   :  { %s515_s18 = scalar_lea.vmem %s53_s10, 1024  ;;  %p520_p0 = scmp.lt.s32.totalorder %s53_s10, %s53_s10 }
  0x3c   :  { %p516_p13 = scmp.ne.s32.totalorder %s53_s10, %s515_s18  ;;  %p521_p1 = scmp.lt.s32.totalorder %s515_s18, %s515_s18 }
  0x3e   :  { %p522_p2 = por %p521_p1, %p520_p0 }
  0x40   :  { %p523_p3 = pnand %p522_p2, %p516_p13 }
  0x42   :  { %526 = shalt.err (!%p523_p3)
}
  0x43   :  { %58 = dma.hbm_to_vmem [thread:$0]  %s670_s3, 1024, %s53_s10, [#allocation11], %s560_s0, %s560_s0, %s561_s24  }
  0x44   :  { %549 = dma.done.wait [#allocation5], 64  }
  0x45   :  { %550 = vsyncadd [#allocation5], 4294967232 }
  0x46   :  { %551 = dma.done.wait [#allocation8], 1088  }
  0x47   :  { %552 = vsyncadd [#allocation8], 4294966208 }
  0x48   :  { %553 = dma.done.wait [#allocation11], 1024  }
  0x49   :  { %554 = vsyncadd [#allocation11], 4294966272  ;;  %v563_v0 = vmov 0.0   ;;  %vm564_vm0 = vmmov 0   ;;  %v423_v1 = vld [vmem:[#allocation9] sm:$0xff]   ;;  %v425_v3 = vld [vmem:[#allocation9 + $0x8] sm:$0xff]  }
  0x4a   :  { %374 = vmatprep.subr.bf16.mxu0 %v563_v0  ;;  %394 = vmatprep.subr.bf16.mxu1 %v563_v0  ;;  %v424_v2 = vld [vmem:[#allocation10] sm:$0xff]   ;;  %v426_v4 = vld [vmem:[#allocation10 + $0x8] sm:$0xff]   ;;  %v427_v5 = vld [vmem:[#allocation9 + $0x10] sm:$0xff]   ;;  %s565_s22 = smov [#allocation12]  }
  0x4b   :  { %390 = vmatprep.mubr.msk.bf16.mxu0 %vm564_vm0, %v563_v0  ;;  %410 = vmatprep.mubr.msk.bf16.mxu1 %vm564_vm0, %v563_v0  ;;  %v428_v6 = vld [vmem:[#allocation10 + $0x10] sm:$0xff]   ;;  %v429_v7 = vld [vmem:[#allocation9 + $0x18] sm:$0xff]   ;;  %v431_v9 = vld [vmem:[#allocation9 + $0x20] sm:$0xff]   ;;  %s327_s23 = sshll.u32 %s565_s22, 4  ;;  %s328_s23 = int_to_ptr.vmem [resolvable:$true] %s327_s23 }
  0x4c   :  { %375 = vmatpush3.bf16.msra.mxu0 %v423_v1  ;;  %395 = vmatpush3.bf16.msra.mxu1 %v424_v2  ;;  %v430_v8 = vld [vmem:[#allocation10 + $0x18] sm:$0xff]   ;;  %v432_v10 = vld [vmem:[#allocation10 + $0x20] sm:$0xff]   ;;  %v433_v11 = vld [vmem:[#allocation9 + $0x28] sm:$0xff]   ;;  %p532_p5 = scmp.lt.s32.totalorder %s328_s23, %s328_s23 }
  0x4d   :  { %376 = vmatprep.subr.bf16.mxu0 %v563_v0  ;;  %396 = vmatprep.subr.bf16.mxu1 %v563_v0  ;;  %v434_v12 = vld [vmem:[#allocation10 + $0x28] sm:$0xff]   ;;  %v435_v13 = vld [vmem:[#allocation9 + $0x30] sm:$0xff]   ;;  %v437_v15 = vld [vmem:[#allocation9 + $0x38] sm:$0xff]  }
  0x4e   :  { %v436_v14 = vld [vmem:[#allocation10 + $0x30] sm:$0xff]   ;;  %v438_v16 = vld [vmem:[#allocation10 + $0x38] sm:$0xff]  }
  0x4f   :  { %v83_v17 = vld [vmem:[#allocation4] sm:$0xf]  ;;  %v191_v18 = vld [vmem:[#allocation7] sm:$0xf] }
  0x50   :  { %377 = vmatpush3.bf16.msra.mxu0 %v425_v3  ;;  %397 = vmatpush3.bf16.msra.mxu1 %v426_v4  ;;  %v354_v19 = vld [vmem:[%s671_s4] ss:$0 sm:$0xff]  ;;  %s527_s4 = scalar_lea.vmem %s328_s23, 128 }
  0x51   :  { %378 = vmatprep.subr.bf16.mxu0 %v563_v0  ;;  %398 = vmatprep.subr.bf16.mxu1 %v563_v0  ;;  %v355_v28 = vld [vmem:[%s672_s5] ss:$0 sm:$0xff]  ;;  %p528_p4 = scmp.ne.s32.totalorder %s328_s23, %s527_s4  ;;  %p533_p6 = scmp.lt.s32.totalorder %s527_s4, %s527_s4 }
  0x53   :  { %p534_p7 = por %p533_p6, %p532_p5 }
  0x54   :  { %379 = vmatpush3.bf16.msra.mxu0 %v427_v5  ;;  %399 = vmatpush3.bf16.msra.mxu1 %v428_v6 }
  0x55   :  { %380 = vmatprep.subr.bf16.mxu0 %v563_v0  ;;  %400 = vmatprep.subr.bf16.mxu1 %v563_v0  ;;  %p535_p8 = pnand %p534_p7, %p528_p4 }
  0x58   :  { %381 = vmatpush3.bf16.msra.mxu0 %v429_v7  ;;  %401 = vmatpush3.bf16.msra.mxu1 %v430_v8 }
  0x59   :  { %382 = vmatprep.subr.bf16.mxu0 %v563_v0  ;;  %402 = vmatprep.subr.bf16.mxu1 %v563_v0 }
  0x5c   :  { %383 = vmatpush3.bf16.msra.mxu0 %v431_v9  ;;  %403 = vmatpush3.bf16.msra.mxu1 %v432_v10 }
  0x5d   :  { %384 = vmatprep.subr.bf16.mxu0 %v563_v0  ;;  %404 = vmatprep.subr.bf16.mxu1 %v563_v0 }
  0x60   :  { %385 = vmatpush3.bf16.msra.mxu0 %v433_v11  ;;  %405 = vmatpush3.bf16.msra.mxu1 %v434_v12 }
  0x61   :  { %386 = vmatprep.subr.bf16.mxu0 %v563_v0  ;;  %406 = vmatprep.subr.bf16.mxu1 %v563_v0 }
  0x64   :  { %387 = vmatpush3.bf16.msra.mxu0 %v435_v13  ;;  %407 = vmatpush3.bf16.msra.mxu1 %v436_v14 }
  0x65   :  { %388 = vmatprep.subr.bf16.mxu0 %v563_v0  ;;  %408 = vmatprep.subr.bf16.mxu1 %v563_v0 }
  0x68   :  { %389 = vmatpush3.bf16.msra.mxu0 %v437_v15  ;;  %409 = vmatpush3.bf16.msra.mxu1 %v438_v16 }
  0x6b   :  { %391 = vmatmul.mubr.bf16.vlgmr.msra.gmra.mrb[0].mxu0 %v83_v17  ;;  %411 = vmatmul.mubr.bf16.vlgmr.msra.gmra.mrb[0].mxu1 %v191_v18 }
 0x13e   :  { %v182_v20 = vpop.f32.mrb[0].mxu0  ;;  %v290_v21 = vpop.f32.mrb[0].mxu1 }
 0x13f   :  { %v392_v22 = vpop.f32.mrb[1].mxu0  ;;  %v310_v23 = vmul.f32 %v354_v19, %v290_v21  ;;  %v412_v24 = vpop.f32.mrb[1].mxu1 }
 0x140   :  { %v185_v25 = vpop.f32.mrb[2].mxu0  ;;  %v293_v26 = vpop.f32.mrb[2].mxu1 }
 0x141   :  { %v393_v27 = vpop.f32.mrb[3].mxu0  ;;  %v311_v29 = vadd.f32 %v310_v23, %v182_v20  ;;  %v413_v30 = vpop.f32.mrb[3].mxu1 }
 0x143   :  { %v319_v31 = vadd.f32 %v355_v28, %v311_v29 }
 0x145   :  { %320 = vst [vmem:[#allocation12] sm:$0xff] %v319_v31 }
 0x146   :  { %538 = shalt.err (!%p535_p8)
}
 0x147   :  { %s539_s27 = scalar_lea.hbm %s673_s6, 128 }
 0x148   :  { %p540_p9 = scmp.ne.s32.totalorder %s673_s6, %s539_s27  ;;  %p543_p10 = scmp.lt.u32.totalorder %s539_s27, %s673_s6 }
 0x14a   :  { %p545_p11 = pnand %p543_p10, %p540_p9 }
 0x14c   :  { %548 = shalt.err (!%p545_p11)
}
 0x14d   :  { %330 = dma.vmem_to_hbm [thread:$0]  %s328_s23, 128, %s673_s6, [#allocation6]  }
 0x14e   :  { %555 = dma.done.wait [#allocation6], 128  }
 0x14f   :  { %556 = vsyncadd [#allocation6], 4294967168 }
 0x150   :  { %334 = vsyncpa [#allocation5], 1 }
 0x151   :  { %335 = vsyncpa [#allocation8], 1 }
 0x152   :  { %336 = vsyncpa [#allocation11], 1 }
 0x153   :  { %337 = vsyncpa [#allocation6], 1 }

</bundles_post_ra>
